<compile_context>
chip_gen: v7x
topology: tpu7x:2x2x1
jax: 0.10.0
libtpu: 0.0.40
codegen_flags: <defaults>
</compile_context>

<pallas_src>
import functools

import jax
import jax.numpy as jnp
from jax.experimental import pallas as pl
from jax.experimental.pallas import tpu as pltpu

_LANE = 128            # lanes per row (fast axis)
_MAX_BLOCK_ROWS = 2048 # 2048 x 128 x 4 B = 1 MiB f32 per input per buffer


def _mse_msle_kernel(x_ref, y_ref, out_ref, *, rows, block_rows, aux_is_l1):
    # Upcast after the DMA (free on the VPU); inputs arrive in native dtype.
    x = x_ref[...].astype(jnp.float32)
    y = y_ref[...].astype(jnp.float32)

    d = x - y
    ld = jnp.log1p(x) - jnp.log1p(y)

    aux = jnp.abs(d) if aux_is_l1 else d * d
    msle = ld * ld

    # Mask the ragged tail of the last row-block (static check: only emitted
    # when the grid does not divide the row count).  Mask BEFORE summing so
    # garbage (possibly NaN/Inf after log1p) rows never reach the accumulator.
    if rows % block_rows != 0:
        base = pl.program_id(0) * block_rows
        row_ids = base + jax.lax.broadcasted_iota(jnp.int32, (block_rows, 1), 0)
        valid = row_ids < rows
        aux = jnp.where(valid, aux, 0.0)
        msle = jnp.where(valid, msle, 0.0)

    # Per-block lane partial sums (cross-vreg VPU adds + one sublane reduce);
    # the scalar reduce + alpha/beta combine happens once, in the wrapper.
    s_aux = jnp.sum(aux, axis=0, keepdims=True)    # (1, 128)
    s_msle = jnp.sum(msle, axis=0, keepdims=True)  # (1, 128)
    out_ref[...] = jnp.concatenate([s_aux, s_msle], axis=0).reshape(1, 2, _LANE)


def mse_msle_loss(x, y, *, alpha=2.0, beta=10.0, auxiliary_loss="mse"):
    """alpha * (MSE or L1)(x, y) + beta * MSLE(x, y), reductions = 'mean'."""
    assert x.shape == y.shape, "input/target must have identical shapes"
    n = int(x.size)
    assert n > 0

    # Flatten in native dtype (no astype copy; the kernel upcasts).
    xf = jnp.ravel(x)
    yf = jnp.ravel(y)

    rem = n % _LANE
    if rem:
        # Rare fallback (n not a multiple of 128): pad out the final lane row.
        # Zero padding contributes 0 to both squared-diff sums, so dividing by
        # the true n stays exact.
        # TODO(synk): avoid this full-array copy for ragged n with a 1-D-block
        # kernel / separate tail term; not needed for typical NCHW sizes.
        pad = _LANE - rem
        xf = jnp.pad(xf, (0, pad))
        yf = jnp.pad(yf, (0, pad))

    rows = xf.size // _LANE
    x2 = xf.reshape(rows, _LANE)
    y2 = yf.reshape(rows, _LANE)

    # Big blocks; if the whole array is smaller than one block, use the full
    # extent (block dim equal to full array dim is always legal).
    block_rows = min(_MAX_BLOCK_ROWS, rows)
    n_blocks = pl.cdiv(rows, block_rows)

    kernel = functools.partial(
        _mse_msle_kernel,
        rows=rows,
        block_rows=block_rows,
        aux_is_l1=(auxiliary_loss != "mse"),
    )

    out_bytes = n_blocks * 2 * _LANE * 4
    partials = pl.pallas_call(
        kernel,
        out_shape=jax.ShapeDtypeStruct((n_blocks, 2, _LANE), jnp.float32),
        grid=(n_blocks,),
        in_specs=[
            pl.BlockSpec((block_rows, _LANE), lambda i: (i, 0)),
            pl.BlockSpec((block_rows, _LANE), lambda i: (i, 0)),
        ],
        out_specs=pl.BlockSpec((1, 2, _LANE), lambda i: (i, 0, 0)),
        compiler_params=pltpu.CompilerParams(
            # Independent blocks -> megacore sharding on v7x; no-op on v5e/v6e.
            dimension_semantics=("parallel",),
        ),
        cost_estimate=pl.CostEstimate(
            flops=7 * n,
            transcendentals=2 * n,
            bytes_accessed=x2.nbytes + y2.nbytes + out_bytes,
        ),
    )(x2, y2)

    sums = jnp.sum(partials, axis=(0, 2))  # (2,) = [sum aux, sum msle]
    inv_n = jnp.float32(1.0 / n)
    return jnp.float32(alpha) * sums[0] * inv_n + jnp.float32(beta) * sums[1] * inv_n


if __name__ == "__main__":
    # Small NCHW-shaped example, positive-valued (MSLE expects values > -1).
    key = jax.random.PRNGKey(0)
    k1, k2 = jax.random.split(key)
    x = jax.random.uniform(k1, (2, 4, 16, 16), dtype=jnp.float32) * 5.0
    y = jax.random.uniform(k2, (2, 4, 16, 16), dtype=jnp.float32) * 5.0

    loss = jax.block_until_ready(mse_msle_loss(x, y, alpha=2.0, beta=10.0))

    # Pure-JAX reference (mirrors the PyTorch module semantics).
    mse_ref = jnp.mean((x - y) ** 2)
    msle_ref = jnp.mean((jnp.log1p(x) - jnp.log1p(y)) ** 2)
    ref = 2.0 * mse_ref + 10.0 * msle_ref

    assert jnp.allclose(loss, ref, rtol=1e-5, atol=1e-5), (loss, ref)
    print("KERNEL_OK")
</pallas_src>

<mosaic_0001>
module attributes {stable_mosaic.version = 11 : i64} {
  func.func @_mse_msle_kernel(%arg0: i32, %arg1: memref<16x128xf32, #tpu.memory_space<vmem>>, %arg2: memref<16x128xf32, #tpu.memory_space<vmem>>, %arg3: memref<1x2x128xf32, #tpu.memory_space<vmem>>) attributes {dimension_semantics = [#tpu.dimension_semantics<parallel>], iteration_bounds = array<i64: 1>, scalar_prefetch = 0 : i64, scratch_operands = 0 : i64, tpu.core_type = #tpu.core_type<tc>, window_params = [{transform_indices = @transform_0, window_bounds = array<i64: 16, 128>}, {transform_indices = @transform_1, window_bounds = array<i64: 16, 128>}, {transform_indices = @transform_2, window_bounds = array<i64: 1, 2, 128>}]} {
    %c0 = arith.constant 0 : index
    %c0_0 = arith.constant 0 : index
    %0 = vector.load %arg1[%c0, %c0_0] : memref<16x128xf32, #tpu.memory_space<vmem>>, vector<16x128xf32>
    %c0_1 = arith.constant 0 : index
    %c0_2 = arith.constant 0 : index
    %1 = vector.load %arg2[%c0_1, %c0_2] : memref<16x128xf32, #tpu.memory_space<vmem>>, vector<16x128xf32>
    %2 = arith.subf %0, %1 : vector<16x128xf32>
    %3 = math.log1p %0 : vector<16x128xf32>
    %4 = math.log1p %1 : vector<16x128xf32>
    %5 = arith.subf %3, %4 : vector<16x128xf32>
    %6 = arith.mulf %2, %2 : vector<16x128xf32>
    %7 = arith.mulf %5, %5 : vector<16x128xf32>
    %cst = arith.constant dense<0.000000e+00> : vector<128xf32>
    %8 = vector.multi_reduction <add>, %6, %cst [0] : vector<16x128xf32> to vector<128xf32>
    %9 = vector.shape_cast %8 : vector<128xf32> to vector<1x128xf32>
    %cst_3 = arith.constant dense<0.000000e+00> : vector<128xf32>
    %10 = vector.multi_reduction <add>, %7, %cst_3 [0] : vector<16x128xf32> to vector<128xf32>
    %11 = vector.shape_cast %10 : vector<128xf32> to vector<1x128xf32>
    %12 = tpu.concatenate %9, %11 in 0 : vector<1x128xf32>, vector<1x128xf32> -> vector<2x128xf32>
    %13 = vector.shape_cast %12 : vector<2x128xf32> to vector<1x2x128xf32>
    %c0_4 = arith.constant 0 : index
    %c0_5 = arith.constant 0 : index
    %c0_6 = arith.constant 0 : index
    %14 = vector.load %arg3[%c0_4, %c0_5, %c0_6] : memref<1x2x128xf32, #tpu.memory_space<vmem>>, vector<1x2x128xf32>
    tpu.vector_store %arg3[%c0_4, %c0_5, %c0_6], %13 {strides = array<i32>} : memref<1x2x128xf32, #tpu.memory_space<vmem>>, vector<1x2x128xf32>,
    return
  }
  func.func @transform_0(%arg0: i32) -> (i32, i32) {
    %c0_i32 = arith.constant 0 : i32
    %c0_i32_0 = arith.constant 0 : i32
    return %arg0, %c0_i32 : i32, i32
  }
  func.func @transform_1(%arg0: i32) -> (i32, i32) {
    %c0_i32 = arith.constant 0 : i32
    %c0_i32_0 = arith.constant 0 : i32
    return %arg0, %c0_i32 : i32, i32
  }
  func.func @transform_2(%arg0: i32) -> (i32, i32, i32) {
    %c0_i32 = arith.constant 0 : i32
    %c0_i32_0 = arith.constant 0 : i32
    %c0_i32_1 = arith.constant 0 : i32
    return %arg0, %c0_i32, %c0_i32_0 : i32, i32, i32
  }
}

</mosaic_0001>

<bundles_post_ra>
// kernel: tpu_custom_call.1
= control target key start
LH: loop header
LB: loop body
LE: loop exit
PB: predicated region body
PF: predicated region fallthrough
CT: control target
= control target key end

     0   :  { %7 = vsyncpa [#allocation3], 0  ;;  %s274_s0 = inlined_call_operand.hbm [shape: f32[16,128], index: 0, kind: input, shape index: {}]   ;;  %s275_s1 = inlined_call_operand.hbm [shape: f32[16,128], index: 1, kind: input, shape index: {}]   ;;  %s276_s2 = inlined_call_operand.hbm [shape: f32[1,2,128], index: 2, kind: output, shape index: {}]  }
   0x1   :  { %8 = vsyncpa [#allocation6], 0 }
   0x2   :  { %9 = vsyncpa [#allocation4], 0  ;;  %s206_s9 = smov [#allocation2]   ;;  %s134_s13 = scalar_lea.hbm %s274_s0, 256 }
   0x3   :  { %s15_s10 = sshll.u32 %s206_s9, 4  ;;  %p135_p0 = scmp.ne.s32.totalorder %s274_s0, %s134_s13  ;;  %s16_s10 = int_to_ptr.vmem [resolvable:$true] %s15_s10 }
   0x4   :  { %p138_p1 = scmp.lt.u32.totalorder %s134_s13, %s274_s0 }
   0x6   :  { %p140_p2 = pnand %p138_p1, %p135_p0 }
   0x8   :  { %143 = shalt.err (!%p140_p2)
}
   0x9   :  { %s144_s18 = scalar_lea.vmem %s16_s10, 256  ;;  %p149_p4 = scmp.lt.s32.totalorder %s16_s10, %s16_s10 }
   0xa   :  { %p145_p3 = scmp.ne.s32.totalorder %s16_s10, %s144_s18  ;;  %p150_p5 = scmp.lt.s32.totalorder %s144_s18, %s144_s18 }
   0xc   :  { %p151_p6 = por %p150_p5, %p149_p4 }
   0xe   :  { %p152_p7 = pnand %p151_p6, %p145_p3 }
  0x10   :  { %155 = shalt.err (!%p152_p7)
}
  0x11   :  { %s207_s19 = smov 128   ;;  %s208_s20 = smov 8  }
  0x12   :  { %21 = dma.hbm_to_vmem [thread:$0]  %s274_s0, 256, %s16_s10, [#allocation3], %s207_s19, %s207_s19, %s208_s20  }
  0x13   :  { %s209_s23 = smov [#allocation5]   ;;  %s156_s27 = scalar_lea.hbm %s275_s1, 256 }
  0x14   :  { %s27_s24 = sshll.u32 %s209_s23, 4  ;;  %p157_p8 = scmp.ne.s32.totalorder %s275_s1, %s156_s27  ;;  %s28_s24 = int_to_ptr.vmem [resolvable:$true] %s27_s24 }
  0x15   :  { %p160_p9 = scmp.lt.u32.totalorder %s156_s27, %s275_s1 }
  0x17   :  { %p162_p10 = pnand %p160_p9, %p157_p8 }
  0x19   :  { %165 = shalt.err (!%p162_p10)
}
  0x1a   :  { %s166_s4 = scalar_lea.vmem %s28_s24, 256  ;;  %p171_p12 = scmp.lt.s32.totalorder %s28_s24, %s28_s24 }
  0x1b   :  { %p167_p11 = scmp.ne.s32.totalorder %s28_s24, %s166_s4  ;;  %p172_p13 = scmp.lt.s32.totalorder %s166_s4, %s166_s4 }
  0x1d   :  { %p173_p0 = por %p172_p13, %p171_p12 }
  0x1f   :  { %p174_p1 = pnand %p173_p0, %p167_p11 }
  0x21   :  { %177 = shalt.err (!%p174_p1)
}
  0x22   :  { %33 = dma.hbm_to_vmem [thread:$0]  %s275_s1, 256, %s28_s24, [#allocation6], %s207_s19, %s207_s19, %s208_s20  }
  0x23   :  { %200 = dma.done.wait [#allocation3], 256  }
  0x24   :  { %201 = vsyncadd [#allocation3], 4294967040 }
  0x25   :  { %202 = dma.done.wait [#allocation6], 256  }
  0x26   :  { %203 = vsyncadd [#allocation6], 4294967040  ;;  %v40_v0 = vld [vmem:[#allocation2] sm:$0xff]  ;;  %v41_v1 = vld [vmem:[#allocation2 + $0x8] sm:$0xff]  ;;  %s210_s1 = smov [#allocation7]   ;;  %vm102_vm4 = vcmask 1040384  }
  0x27   :  { %v42_v2 = vld [vmem:[#allocation5] sm:$0xff]  ;;  %v46_v3 = vadd.f32 1.0, %v40_v0  ;;  %v43_v4 = vld [vmem:[#allocation5 + $0x8] sm:$0xff]  ;;  %v55_v5 = vadd.f32 1.0, %v41_v1  ;;  %v49_v9 = vmul.f32 -0.5, %v40_v0  ;;  %v58_v11 = vmul.f32 -0.5, %v41_v1 }
  0x28   :  { %v44_v6 = vsub.f32 %v40_v0, %v42_v2  ;;  %v45_v7 = vsub.f32 %v41_v1, %v43_v4  ;;  %v64_v8 = vadd.f32 1.0, %v42_v2  ;;  %v73_v10 = vadd.f32 1.0, %v43_v4  ;;  %s111_s6 = sshll.u32 %s210_s1, 4  ;;  %s112_s6 = int_to_ptr.vmem [resolvable:$true] %s111_s6 }
  0x29   :  { %126 = vlog2.f32 %v46_v3  ;;  %v67_v12 = vmul.f32 -0.5, %v42_v2  ;;  %v50_v15 = vadd.f32 1.0, %v49_v9  ;;  %v76_v16 = vmul.f32 -0.5, %v43_v4  ;;  %s178_s7 = scalar_lea.vmem %s112_s6, 32  ;;  %p183_p3 = scmp.lt.s32.totalorder %s112_s6, %s112_s6 }
  0x2a   :  { %128 = vlog2.f32 %v55_v5  ;;  %v84_v13 = vmul.f32 %v44_v6, %v44_v6  ;;  %v85_v14 = vmul.f32 %v45_v7, %v45_v7  ;;  %v52_v17 = vand.u32 2147483647, %v40_v0  ;;  %p179_p2 = scmp.ne.s32.totalorder %s112_s6, %s178_s7  ;;  %p184_p4 = scmp.lt.s32.totalorder %s178_s7, %s178_s7 }
  0x2b   :  { %130 = vlog2.f32 %v64_v8  ;;  %v59_v18 = vadd.f32 1.0, %v58_v11  ;;  %v61_v19 = vand.u32 2147483647, %v41_v1  ;;  %v68_v20 = vadd.f32 1.0, %v67_v12 }
  0x2c   :  { %132 = vlog2.f32 %v73_v10  ;;  %v70_v21 = vand.u32 2147483647, %v42_v2  ;;  %v88_v22 = vadd.f32 %v85_v14, %v84_v13  ;;  %v51_v23 = vmul.f32 %v50_v15, %v40_v0  ;;  %p185_p5 = por %p184_p4, %p183_p3 }
  0x2d   :  { %v77_v24 = vadd.f32 1.0, %v76_v16  ;;  %vm250_vm0 = vcmp.lt.f32.partialorder %v52_v17, 0.0004427343  ;;  %v79_v27 = vand.u32 2147483647, %v43_v4  ;;  %v60_v30 = vmul.f32 %v59_v18, %v41_v1 }
  0x2e   :  { %vm254_vm1 = vcmp.lt.f32.partialorder %v61_v19, 0.0004427343  ;;  %v69_v32 = vmul.f32 %v68_v20, %v42_v2  ;;  %vm71_vm2 = vcmp.lt.f32.partialorder %v70_v21, 0.0004427343  ;;  %v89_v35 = vrot.slane %v88_v22, 4  ;;  %p186_p6 = pnand %p185_p5, %p179_p2 }
  0x2f   :  { %v78_v38 = vmul.f32 %v77_v24, %v43_v4  ;;  %vm80_vm3 = vcmp.lt.f32.partialorder %v79_v27, 0.0004427343 }
  0x30   :  { %v90_v44 = vadd.f32 %v89_v35, %v88_v22 }
  0x32   :  { %v91_v49 = vrot.slane %v90_v44, 2 }
  0x33   :  { %v127_v25 = vpop.eup %126 }
  0x34   :  { %v129_v28 = vpop.eup %128  ;;  %v48_v29 = vmul.f32 0.6931472, %v127_v25  ;;  %v92_v51 = vadd.f32 %v91_v49, %v90_v44 }
  0x35   :  { %v131_v33 = vpop.eup %130  ;;  %v57_v34 = vmul.f32 0.6931472, %v129_v28 }
  0x36   :  { %v54_v36 = vsel %vm250_vm0, %v51_v23, %v48_v29  ;;  %v66_v37 = vmul.f32 0.6931472, %v131_v33  ;;  %v133_v39 = vpop.eup %132  ;;  %v93_v54 = vrot.slane %v92_v51, 1 }
  0x37   :  { %v63_v40 = vsel %vm254_vm1, %v60_v30, %v57_v34  ;;  %v75_v42 = vmul.f32 0.6931472, %v133_v39 }
  0x38   :  { %v72_v41 = vsel %vm71_vm2, %v69_v32, %v66_v37  ;;  %v94_v57 = vadd.f32 %v93_v54, %v92_v51 }
  0x39   :  { %v82_v43 = vsub.f32 %v54_v36, %v72_v41  ;;  %v81_v45 = vsel %vm80_vm3, %v78_v38, %v75_v42 }
  0x3a   :  { %v83_v46 = vsub.f32 %v63_v40, %v81_v45 }
  0x3b   :  { %v86_v47 = vmul.f32 %v82_v43, %v82_v43 }
  0x3c   :  { %v87_v48 = vmul.f32 %v83_v46, %v83_v46 }
  0x3e   :  { %v95_v50 = vadd.f32 %v87_v48, %v86_v47 }
  0x40   :  { %v96_v52 = vrot.slane %v95_v50, 4 }
  0x42   :  { %v97_v53 = vadd.f32 %v96_v52, %v95_v50 }
  0x44   :  { %v98_v55 = vrot.slane %v97_v53, 2 }
  0x46   :  { %v99_v56 = vadd.f32 %v98_v55, %v97_v53 }
  0x48   :  { %v100_v58 = vrot.slane %v99_v56, 1 }
  0x4a   :  { %v101_v59 = vadd.f32 %v100_v58, %v99_v56 }
  0x4c   :  { %v103_v60 = vsel %vm102_vm4, %v94_v57, %v101_v59 }
  0x4d   :  { %104 = vst [vmem:[#allocation7] sm:$0x3] %v103_v60 }
  0x4e   :  { %189 = shalt.err (!%p186_p6)
}
  0x4f   :  { %s190_s10 = scalar_lea.hbm %s276_s2, 32 }
  0x50   :  { %p191_p7 = scmp.ne.s32.totalorder %s276_s2, %s190_s10  ;;  %p194_p8 = scmp.lt.u32.totalorder %s190_s10, %s276_s2 }
  0x52   :  { %p196_p9 = pnand %p194_p8, %p191_p7 }
  0x54   :  { %199 = shalt.err (!%p196_p9)
}
  0x55   :  { %114 = dma.vmem_to_hbm [thread:$0]  %s112_s6, 32, %s276_s2, [#allocation4]  }
  0x56   :  { %204 = dma.done.wait [#allocation4], 32  }
  0x57   :  { %205 = vsyncadd [#allocation4], 4294967264 }
  0x58   :  { %118 = vsyncpa [#allocation3], 1 }
  0x59   :  { %119 = vsyncpa [#allocation6], 1 }
  0x5a   :  { %120 = vsyncpa [#allocation4], 1 }

</bundles_post_ra>
